<compile_context>
chip_gen: v5e
topology: v5e:2x2
jax: 0.10.0
libtpu: 0.0.40
codegen_flags: <defaults>
</compile_context>

<pallas_src>
import functools

import jax
import jax.numpy as jnp
from jax.experimental import pallas as pl
from jax.experimental.pallas import tpu as pltpu


def _least_squares_kernel(x_ref, w_ref, o_ref):
    # x_ref: (TM, K) f32, w_ref: (1, K) f32 (lane-dense, resident across the grid).
    # VPU elementwise multiply + XLU lane reduce -> (TM, 1).
    x = x_ref[...]
    w = w_ref[...]
    o_ref[...] = jnp.sum(x * w, axis=-1, keepdims=True).astype(o_ref.dtype)


def _pick_tile_m(batch: int, input_dim: int, itemsize: int = 4) -> int:
    # Keep each x block <= ~4 MiB so the double-buffered pair (+ weight + output)
    # fits comfortably inside even v5e's 16 MiB default scoped VMEM.
    budget = 4 * 1024 * 1024
    tm = max(8, min(budget // (input_dim * itemsize), 512, batch))
    tm = max(8, (tm // 8) * 8)  # sublane tiling: second-to-last block dim % 8 == 0
    return tm


@functools.partial(jax.jit, static_argnames=("tile_m",))
def least_squares_nn(x, weight, *, tile_m=None):
    """Forward pass of LeastSquaresNN: y = x @ weight.T.

    x:      (batch, input_dim) float32
    weight: (1, input_dim) float32  -- same layout as torch nn.Linear(input_dim, 1).weight
    returns (batch, 1) float32
    """
    batch, input_dim = x.shape
    tm = tile_m if tile_m is not None else _pick_tile_m(batch, input_dim)

    # Pad batch to a multiple of the tile so every grid step sees a full block.
    batch_p = pl.cdiv(batch, tm) * tm
    if batch_p != batch:
        x = jnp.pad(x, ((0, batch_p - batch), (0, 0)))

    grid = (batch_p // tm,)

    # Advisory cost hint for XLA scheduling around the custom call.
    flops = 2 * batch_p * input_dim
    bytes_accessed = 4 * (batch_p * input_dim + input_dim + batch_p)

    # NOTE: for very wide input_dim (>~32k f32) a trailing "arbitrary" K axis with a
    # small f32 accumulator would be needed; not required at these sizes.
    out = pl.pallas_call(
        _least_squares_kernel,
        out_shape=jax.ShapeDtypeStruct((batch_p, 1), x.dtype),
        grid_spec=pltpu.PrefetchScalarGridSpec(
            num_scalar_prefetch=0,
            grid=grid,
            in_specs=[
                # Batch-tiled x: pipelined HBM -> VMEM streaming.
                pl.BlockSpec((tm, input_dim), lambda i: (i, 0)),
                # Weight: lane-dense (1, K), constant block index -> stays resident.
                pl.BlockSpec((1, input_dim), lambda i: (0, 0)),
            ],
            out_specs=pl.BlockSpec((tm, 1), lambda i: (i, 0)),
        ),
        compiler_params=pltpu.CompilerParams(
            # Batch tiles are independent: shard across both TensorCores on v7x.
            dimension_semantics=("parallel",),
        ),
        cost_estimate=pl.CostEstimate(
            flops=flops, transcendentals=0, bytes_accessed=bytes_accessed
        ),
    )(x, weight)

    return out[:batch]


if __name__ == "__main__":
    key = jax.random.PRNGKey(0)
    k_x, k_w = jax.random.split(key)

    # Small demo shapes; batch deliberately NOT a multiple of the tile to
    # exercise the padding / multi-step grid path.
    batch, input_dim = 200, 32
    x = jax.random.normal(k_x, (batch, input_dim), dtype=jnp.float32)
    # Mimic nn.Linear default init U(-1/sqrt(fan_in), 1/sqrt(fan_in)).
    bound = 1.0 / jnp.sqrt(jnp.float32(input_dim))
    weight = jax.random.uniform(
        k_w, (1, input_dim), minval=-bound, maxval=bound, dtype=jnp.float32
    )

    out = least_squares_nn(x, weight, tile_m=64)  # 4 grid steps, last one padded
    jax.block_until_ready(out)

    # Reference check against plain JAX.
    ref = x @ weight.T
    assert out.shape == (batch, 1)
    assert jnp.allclose(out, ref, atol=1e-5, rtol=1e-5), float(
        jnp.max(jnp.abs(out - ref))
    )
    print("KERNEL_OK")
</pallas_src>

<mosaic_0001>
module attributes {stable_mosaic.version = 11 : i64} {
  func.func @_least_squares_kernel(%arg0: i32, %arg1: memref<64x32xf32, #tpu.memory_space<vmem>>, %arg2: memref<1x32xf32, #tpu.memory_space<vmem>>, %arg3: memref<64x1xf32, #tpu.memory_space<vmem>>) attributes {dimension_semantics = [#tpu.dimension_semantics<parallel>], iteration_bounds = array<i64: 4>, scalar_prefetch = 0 : i64, scratch_operands = 0 : i64, tpu.core_type = #tpu.core_type<tc>, window_params = [{transform_indices = @transform_0, window_bounds = array<i64: 64, 32>}, {pipeline_mode = #tpu.pipeline_mode<synchronous>, transform_indices = @transform_1, window_bounds = array<i64: 1, 32>}, {transform_indices = @transform_2, window_bounds = array<i64: 64, 1>}]} {
    %c0 = arith.constant 0 : index
    %c0_0 = arith.constant 0 : index
    %0 = vector.load %arg1[%c0, %c0_0] : memref<64x32xf32, #tpu.memory_space<vmem>>, vector<64x32xf32>
    %c0_1 = arith.constant 0 : index
    %c0_2 = arith.constant 0 : index
    %1 = vector.load %arg2[%c0_1, %c0_2] : memref<1x32xf32, #tpu.memory_space<vmem>>, vector<1x32xf32>
    %2 = vector.broadcast %1 : vector<1x32xf32> to vector<64x32xf32>
    %3 = arith.mulf %0, %2 : vector<64x32xf32>
    %cst = arith.constant dense<0.000000e+00> : vector<64xf32>
    %4 = vector.multi_reduction <add>, %3, %cst [1] : vector<64x32xf32> to vector<64xf32>
    %5 = vector.shape_cast %4 : vector<64xf32> to vector<64x1xf32>
    %c0_3 = arith.constant 0 : index
    %c0_4 = arith.constant 0 : index
    %6 = vector.load %arg3[%c0_3, %c0_4] : memref<64x1xf32, #tpu.memory_space<vmem>>, vector<64x1xf32>
    tpu.vector_store %arg3[%c0_3, %c0_4], %5 {strides = array<i32>} : memref<64x1xf32, #tpu.memory_space<vmem>>, vector<64x1xf32>,
    return
  }
  func.func @transform_0(%arg0: i32) -> (i32, i32) {
    %c0_i32 = arith.constant 0 : i32
    %c0_i32_0 = arith.constant 0 : i32
    return %arg0, %c0_i32 : i32, i32
  }
  func.func @transform_1(%arg0: i32) -> (i32, i32) {
    %c0_i32 = arith.constant 0 : i32
    %c0_i32_0 = arith.constant 0 : i32
    %c0_i32_1 = arith.constant 0 : i32
    return %c0_i32, %c0_i32_0 : i32, i32
  }
  func.func @transform_2(%arg0: i32) -> (i32, i32) {
    %c0_i32 = arith.constant 0 : i32
    %c0_i32_0 = arith.constant 0 : i32
    return %arg0, %c0_i32 : i32, i32
  }
}

</mosaic_0001>

<bundles_post_ra>
// kernel: least_squares_nn.1
= control target key start
LH: loop header
LB: loop body
LE: loop exit
PB: predicated region body
PF: predicated region fallthrough
CT: control target
= control target key end

     0   :  { %s300_s9 = smov 0   ;;  %s343_s0 = inlined_call_operand.vmem [shape: f32[256,32], index: 0, kind: input, shape index: {}]   ;;  %s344_s1 = inlined_call_operand.vmem [shape: f32[1,32], index: 1, kind: input, shape index: {}]   ;;  %s345_s2 = inlined_call_operand.vmem [shape: f32[256,1], index: 2, kind: output, shape index: {}]  }
   0x1 LB: > { %s257_s10 = sadd.s32 4294967295, %s283_s9   ;;  %p261_p0 = scmp.ge.s32.totalorder %s283_s9, 1  ;;  %s283_s9 = sphi %s300_s9, %s12_s9  }
   0x2   : > { %p113_p1 = scmp.lt.s32.totalorder %s283_s9, 5 }
   0x4   : > { %p114_p2 = pnand %p261_p0, %p113_p1 }
   0x5   : > { %s262_s11 = sshll.u32 (!%p114_p2), %s257_s10, 3 }
   0x6   : > { %117 = sbr.rel (%p114_p2) target bundleno = 152 (0x98), region = 28  ;;  %p136_p3 = scmp.lt.s32.totalorder (!%p114_p2), %s262_s11, 31 }
   0xb   : > { %s347_s11 = smov (!%p136_p3, %s262_s11), 31  ;;  %v276_v0 = vld [vmem:[%s344_s1] ss:$0 sm:$0xff]  ;;  %vm167_vm0 = vcmask 261120   ;;  %vm192_vm1 = vcmask 7168  }
   0xc   : > { %s263_s14 = sshll.u32 %s347_s11, 3 }
   0xd   : > { %s139_s17 = scalar_lea.vmem %s343_s0, %s263_s14  ;;  %s145_s20 = scalar_lea.vmem %s345_s2, %s263_s14 }
   0xe   : > { %v149_v1 = vld [vmem:[%s139_s17 + $0x10] sm:$0xff]  ;;  %v147_v2 = vld [vmem:[%s139_s17] sm:$0xff]  ;;  %v150_v7 = vld [vmem:[%s139_s17 + $0x18] sm:$0xff] }
   0xf   : > { %v151_v3 = vld [vmem:[%s139_s17 + $0x20] sm:$0xff]  ;;  %v161_v4 = vmul.f32 %v276_v0, %v149_v1  ;;  %v159_v5 = vmul.f32 %v276_v0, %v147_v2  ;;  %v148_v8 = vld [vmem:[%s139_s17 + $0x8] sm:$0xff]  ;;  %v162_v13 = vmul.f32 %v276_v0, %v150_v7  ;;  %v154_v19 = vld [vmem:[%s139_s17 + $0x38] sm:$0xff] }
  0x10   : > { %v163_v6 = vmul.f32 %v276_v0, %v151_v3  ;;  %v152_v12 = vld [vmem:[%s139_s17 + $0x28] sm:$0xff]  ;;  %v160_v14 = vmul.f32 %v276_v0, %v148_v8  ;;  %v153_v20 = vld [vmem:[%s139_s17 + $0x30] sm:$0xff]  ;;  %v166_v21 = vmul.f32 %v276_v0, %v154_v19 }
  0x11   : > { %v174_v9 = vsel %vm167_vm0, %v161_v4, 0.0  ;;  %v168_v10 = vsel %vm167_vm0, %v159_v5, 0.0  ;;  %v164_v15 = vmul.f32 %v276_v0, %v152_v12  ;;  %v177_v16 = vsel %vm167_vm0, %v162_v13, 0.0 }
  0x12   : > { %v180_v11 = vsel %vm167_vm0, %v163_v6, 0.0  ;;  %175 = vadd.xlane.f32.xlu1 %v174_v9  ;;  %169 = vadd.xlane.f32.xlu0 %v168_v10  ;;  %v171_v17 = vsel %vm167_vm0, %v160_v14, 0.0  ;;  %v165_v22 = vmul.f32 %v276_v0, %v153_v20  ;;  %v189_v23 = vsel %vm167_vm0, %v166_v21, 0.0 }
  0x13   : > { %181 = vadd.xlane.f32.xlu2 %v180_v11  ;;  %v183_v18 = vsel %vm167_vm0, %v164_v15, 0.0 }
  0x14   : > { %v186_v24 = vsel %vm167_vm0, %v165_v22, 0.0 }
  0x1a   : > { %178 = vadd.xlane.f32.xlu1 %v177_v16  ;;  %172 = vadd.xlane.f32.xlu0 %v171_v17 }
  0x1b   : > { %184 = vadd.xlane.f32.xlu2 %v183_v18 }
  0x22   : > { %190 = vadd.xlane.f32.xlu1 %v189_v23  ;;  %187 = vadd.xlane.f32.xlu0 %v186_v24 }
  0x85   : > { %v176_v25 = vpop.xlane.xlu1 %175  ;;  %v170_v26 = vpop.xlane.xlu0 %169 }
  0x86   : > { %195 = vst.msk [vmem:[%s145_s20 + $0x10] sm:$0xff] %vm192_vm1, %v176_v25  ;;  %v182_v27 = vpop.xlane.xlu2 %181 }
  0x87   : > { %193 = vst.msk [vmem:[%s145_s20] sm:$0xff] %vm192_vm1, %v170_v26 }
  0x88   : > { %197 = vst.msk [vmem:[%s145_s20 + $0x20] sm:$0xff] %vm192_vm1, %v182_v27 }
  0x8d   : > { %v179_v28 = vpop.xlane.xlu1 %178  ;;  %v173_v29 = vpop.xlane.xlu0 %172 }
  0x8e   : > { %196 = vst.msk [vmem:[%s145_s20 + $0x18] sm:$0xff] %vm192_vm1, %v179_v28  ;;  %v185_v30 = vpop.xlane.xlu2 %184 }
  0x8f   : > { %194 = vst.msk [vmem:[%s145_s20 + $0x8] sm:$0xff] %vm192_vm1, %v173_v29 }
  0x90   : > { %198 = vst.msk [vmem:[%s145_s20 + $0x28] sm:$0xff] %vm192_vm1, %v185_v30 }
  0x95   : > { %v191_v31 = vpop.xlane.xlu1 %190  ;;  %v188_v32 = vpop.xlane.xlu0 %187 }
  0x96   : > { %200 = vst.msk [vmem:[%s145_s20 + $0x38] sm:$0xff] %vm192_vm1, %v191_v31 }
  0x97   : > { %199 = vst.msk [vmem:[%s145_s20 + $0x30] sm:$0xff] %vm192_vm1, %v188_v32 }
  0x98 PF: > { %s12_s9 = sadd.s32 1, %s283_s9  }
  0x99   : > { %p9_p4 = scmp.ge.s32.totalorder %s12_s9, 6  }
  0x9b   :  { %11 = sbr.rel (!%p9_p4) target bundleno = 1 (0x1), region = 58 }

</bundles_post_ra>
